<compile_context>
chip_gen: v7x
topology: tpu7x:2x2x1
jax: 0.10.0
libtpu: 0.0.40
codegen_flags: <defaults>
</compile_context>

<pallas_src>
import functools

import jax
import jax.numpy as jnp
from jax import lax
from jax.experimental import pallas as pl
from jax.experimental.pallas import tpu as pltpu

MAX_TOKENS_PER_TILE = 512   # output rows per grid step (multiple of 8)
DMA_RING = 8                # in-flight row DMAs for the HBM-gather path
ONEHOT_MAX_VOCAB = 4096     # one-hot MXU path only for small vocabularies


def _round_up(n, m):
    return ((n + m - 1) // m) * m


def _vmem_capacity_bytes():
    try:
        return int(pltpu.get_tpu_info().vmem_capacity_bytes)
    except Exception:
        return 64 << 20     # conservative: v7x per-TensorCore capacity


def _choose_tile(n_tok, per_row_bytes, row_budget_bytes):
    """Largest tile (multiple of 8, <= MAX, fitting the VMEM row budget) that,
    if possible, divides n_tok exactly so no pad + output-slice copy is needed."""
    by_vmem = max(8, (row_budget_bytes // max(per_row_bytes, 1)) // 8 * 8)
    upper = min(MAX_TOKENS_PER_TILE, by_vmem)
    n_up = _round_up(n_tok, 8)
    if n_up <= upper:                       # everything fits in one tile
        return n_up
    floor = max(8, (upper // 4) // 8 * 8)   # don't shrink tiles below ~upper/4
    t = upper
    while t >= floor:
        if n_tok % t == 0:
            return t
        t -= 8
    return upper                            # no good divisor: pad the tail tile


def _pad_tokens(ids, scale, tile):
    n_tok = ids.shape[0]
    n_pad = _round_up(n_tok, tile)
    if n_pad != n_tok:
        ids = jnp.pad(ids, (0, n_pad - n_tok))
        scale = jnp.pad(scale, (0, n_pad - n_tok))
    return ids, scale, n_pad


# ---------------------------------------------------------------------------
# Path 1: small vocab -- one-hot MXU matmul, table resident once in VMEM.
# ---------------------------------------------------------------------------
def _onehot_kernel(ids_ref, scale_ref, table_ref, out_ref, *, vocab_size):
    ids = ids_ref[...]                                               # (tile, 1) int32
    iota = lax.broadcasted_iota(jnp.int32, (ids.shape[0], vocab_size), 1)
    one_hot = (ids == iota).astype(table_ref.dtype)                  # (tile, V)
    emb = jnp.dot(one_hot, table_ref[...], preferred_element_type=jnp.float32)
    # Mask fused into the single lane-dense full-tile store.
    out_ref[...] = emb * scale_ref[...]


@jax.jit
def _embed_onehot(x, table, mask):
    B, S = x.shape
    V, D = table.shape
    n_tok = B * S
    cap = _vmem_capacity_bytes()

    # Clamp once here (VMEM/one-hot lookups have no hardware bounds check).
    # NOTE: silently maps out-of-range ids to valid rows (PyTorch would raise).
    ids = jnp.clip(x.reshape(n_tok).astype(jnp.int32), 0, V - 1)
    scale = (jnp.ones((n_tok,), jnp.float32) if mask is None
             else (mask.reshape(n_tok) > 0).astype(jnp.float32))

    table_bytes = V * D * 4
    # double-buffered out + one-hot intermediate + matmul result + ids/scale
    per_row = 2 * D * 4 + V * 4 + D * 4 + 32
    budget = max(1, cap - table_bytes - (12 << 20))
    tile = _choose_tile(n_tok, per_row, budget)
    ids, scale, n_pad = _pad_tokens(ids, scale, tile)

    vmem_limit = int(min(cap - (4 << 20),
                         max(table_bytes + tile * per_row + (8 << 20), 32 << 20)))

    embed = pl.pallas_call(
        functools.partial(_onehot_kernel, vocab_size=V),
        out_shape=jax.ShapeDtypeStruct((n_pad, D), jnp.float32),
        grid=(n_pad // tile,),
        in_specs=[
            pl.BlockSpec((tile, 1), lambda i: (i, 0)),              # ids  (VMEM block)
            pl.BlockSpec((tile, 1), lambda i: (i, 0)),              # mask scale (VMEM block)
            pl.BlockSpec(memory_space=pltpu.MemorySpace.VMEM),      # table: single VMEM copy
        ],
        out_specs=pl.BlockSpec((tile, D), lambda i: (i, 0)),
        compiler_params=pltpu.CompilerParams(
            dimension_semantics=("parallel",),
            vmem_limit_bytes=vmem_limit,
        ),
    )(ids.reshape(n_pad, 1), scale.reshape(n_pad, 1), table)

    if n_pad != n_tok:
        embed = embed[:n_tok]
    return embed.reshape(B, S, D)


# ---------------------------------------------------------------------------
# Path 2: large vocab -- table stays in HBM, per-row DMA gather (ring of 8).
# ---------------------------------------------------------------------------
def _hbm_gather_kernel(ids_ref, scale_ref, table_ref, out_ref, sem, *, tokens_per_tile):
    n = tokens_per_tile
    base = pl.program_id(0) * n

    def row_copy(tok, row, slot):
        return pltpu.make_async_copy(
            table_ref.at[pl.ds(tok, 1), :],      # one (1, D) row from the HBM table
            out_ref.at[pl.ds(row, 1), :],        # straight into the output block
            sem.at[slot],
        )

    ring = min(DMA_RING, n)

    def prologue(r, c):                          # fill the ring
        row_copy(ids_ref[base + r], r, r).start()
        return c
    lax.fori_loop(0, ring, prologue, 0)

    def steady(r, c):                            # wait oldest, issue next
        slot = lax.rem(r, DMA_RING)
        row_copy(0, r, slot).wait()
        row_copy(ids_ref[base + r], r, slot).start()
        return c
    lax.fori_loop(ring, n, steady, 0)

    def drain(r, c):                             # drain the last `ring` copies
        row_copy(0, r, lax.rem(r, DMA_RING)).wait()
        return c
    lax.fori_loop(n - ring, n, drain, 0)

    # One vectorized mask multiply over the gathered block.
    out_ref[...] = out_ref[...] * scale_ref[...]


@jax.jit
def _embed_hbm_gather(x, table, mask):
    B, S = x.shape
    V, D = table.shape
    n_tok = B * S
    cap = _vmem_capacity_bytes()

    ids = jnp.clip(x.reshape(n_tok).astype(jnp.int32), 0, V - 1)
    scale = (jnp.ones((n_tok,), jnp.float32) if mask is None
             else (mask.reshape(n_tok) > 0).astype(jnp.float32))

    per_row = 2 * D * 4 + 8 + 32                 # double-buffered out + scale + slack
    budget = max(1, cap - (12 << 20))
    tile = _choose_tile(n_tok, per_row, budget)
    ids, scale, n_pad = _pad_tokens(ids, scale, tile)

    vmem_limit = int(min(cap - (4 << 20),
                         max(tile * per_row + (8 << 20), 32 << 20)))

    embed = pl.pallas_call(
        functools.partial(_hbm_gather_kernel, tokens_per_tile=tile),
        out_shape=jax.ShapeDtypeStruct((n_pad, D), jnp.float32),
        grid_spec=pltpu.PrefetchScalarGridSpec(
            num_scalar_prefetch=1,                                   # ids -> SMEM
            grid=(n_pad // tile,),
            in_specs=[
                pl.BlockSpec((tile, 1), lambda i, ids_s: (i, 0)),    # mask scale (VMEM block)
                pl.BlockSpec(memory_space=pl.ANY),                   # table stays in HBM
            ],
            out_specs=pl.BlockSpec((tile, D), lambda i, ids_s: (i, 0)),
            scratch_shapes=[pltpu.SemaphoreType.DMA((DMA_RING,))],
        ),
        compiler_params=pltpu.CompilerParams(
            dimension_semantics=("parallel",),
            vmem_limit_bytes=vmem_limit,
        ),
    )(ids, scale.reshape(n_pad, 1), table)

    if n_pad != n_tok:
        embed = embed[:n_tok]
    return embed.reshape(B, S, D)


# ---------------------------------------------------------------------------
# Public wrapper (mirrors Embedder.forward)
# ---------------------------------------------------------------------------
def embedder_forward(x, table, mask=None, *, force_hbm_gather=False):
    """JAX/Pallas equivalent of Embedder.forward: returns (embed, mask)."""
    V, D = table.shape
    cap = _vmem_capacity_bytes()
    table_fits_vmem = (V * D * 4) <= max(cap // 3, 8 << 20)
    if (not force_hbm_gather) and V <= ONEHOT_MAX_VOCAB and table_fits_vmem:
        embed = _embed_onehot(x, table, mask)
    else:
        embed = _embed_hbm_gather(x, table, mask)
    # mask is returned exactly as passed in (object identity preserved).
    return embed, mask


def init_embedding_table(key, vocab_size, dim, padding_idx):
    """nn.Embedding default init: N(0, 1), with the padding row zeroed."""
    w = jax.random.normal(key, (vocab_size, dim), dtype=jnp.float32)
    w = w.at[padding_idx].set(0.0)
    return w


if __name__ == "__main__":
    key = jax.random.PRNGKey(0)
    k_tab, k_ids, k_mask = jax.random.split(key, 3)

    VOCAB, DIM, PAD_IDX = 64, 128, 1
    B, S = 2, 8

    table = init_embedding_table(k_tab, VOCAB, DIM, PAD_IDX)
    x = jax.random.randint(k_ids, (B, S), 0, VOCAB, dtype=jnp.int32)
    mask = jax.random.randint(k_mask, (B, S), 0, 2, dtype=jnp.int32)

    ref = table[x] * (mask > 0).astype(jnp.float32)[..., None]
    ref_nomask = table[x]

    # Small-vocab path (one-hot MXU matmul, table resident in VMEM).
    embed, mask_out = embedder_forward(x, table, mask)
    embed = jax.block_until_ready(embed)
    embed_nomask, none_out = embedder_forward(x, table, None)
    embed_nomask = jax.block_until_ready(embed_nomask)
    assert embed.shape == (B, S, DIM) and embed.dtype == jnp.float32
    assert jnp.allclose(embed, ref)
    assert jnp.allclose(embed_nomask, ref_nomask)
    assert mask_out is mask
    assert none_out is None

    # Large-vocab path (table kept in HBM, per-row DMA gather), forced on the
    # same small inputs so both code paths are exercised and checked.
    embed_g, _ = embedder_forward(x, table, mask, force_hbm_gather=True)
    embed_g = jax.block_until_ready(embed_g)
    assert jnp.allclose(embed_g, ref)
    embed_gn, _ = embedder_forward(x, table, None, force_hbm_gather=True)
    assert jnp.allclose(jax.block_until_ready(embed_gn), ref_nomask)

    # Odd token count exercises the pad-to-tile fallback.
    x2 = jax.random.randint(jax.random.PRNGKey(7), (3, 7), 0, VOCAB, dtype=jnp.int32)
    mask2 = jax.random.randint(jax.random.PRNGKey(8), (3, 7), 0, 2, dtype=jnp.int32)
    embed2, _ = embedder_forward(x2, table, mask2)
    embed2 = jax.block_until_ready(embed2)
    ref2 = table[x2] * (mask2 > 0).astype(jnp.float32)[..., None]
    assert jnp.allclose(embed2, ref2)

    print("KERNEL_OK")
</pallas_src>

<mosaic_0001>
module attributes {stable_mosaic.version = 11 : i64} {
  func.func @_onehot_kernel(%arg0: i32, %arg1: memref<16x1xi32, #tpu.memory_space<vmem>>, %arg2: memref<16x1xf32, #tpu.memory_space<vmem>>, %arg3: memref<64x128xf32, #tpu.memory_space<vmem>>, %arg4: memref<16x128xf32, #tpu.memory_space<vmem>>) attributes {dimension_semantics = [#tpu.dimension_semantics<parallel>], iteration_bounds = array<i64: 1>, scalar_prefetch = 0 : i64, scratch_operands = 0 : i64, tpu.core_type = #tpu.core_type<tc>, window_params = [{transform_indices = @transform_0, window_bounds = array<i64: 16, 1>}, {transform_indices = @transform_1, window_bounds = array<i64: 16, 1>}, {pipeline_mode = #tpu.pipeline_mode<synchronous>, transform_indices = @transform_2, window_bounds = array<i64: 64, 128>}, {transform_indices = @transform_3, window_bounds = array<i64: 16, 128>}]} {
    %c0 = arith.constant 0 : index
    %c0_0 = arith.constant 0 : index
    %0 = vector.load %arg1[%c0, %c0_0] : memref<16x1xi32, #tpu.memory_space<vmem>>, vector<16x1xi32>
    %1 = tpu.iota {dimensions = array<i32: 1>} : vector<16x64xi32>
    %2 = vector.broadcast %0 : vector<16x1xi32> to vector<16x64xi32>
    %3 = arith.cmpi eq, %2, %1 : vector<16x64xi32>
    %4 = arith.extui %3 : vector<16x64xi1> to vector<16x64xi32>
    %5 = arith.sitofp %4 : vector<16x64xi32> to vector<16x64xf32>
    %c0_1 = arith.constant 0 : index
    %c0_2 = arith.constant 0 : index
    %6 = vector.load %arg3[%c0_1, %c0_2] : memref<64x128xf32, #tpu.memory_space<vmem>>, vector<64x128xf32>
    %cst = arith.constant dense<0.000000e+00> : vector<16x128xf32>
    %7 = tpu.matmul %5, %6, %cst {dimension_numbers = #tpu.dot_dimension_numbers<[1], [0], [0], [1], [0, 0, 1, 1], [], []>} : vector<16x64xf32>, vector<64x128xf32>, vector<16x128xf32> -> vector<16x128xf32>
    %c0_3 = arith.constant 0 : index
    %c0_4 = arith.constant 0 : index
    %8 = vector.load %arg2[%c0_3, %c0_4] : memref<16x1xf32, #tpu.memory_space<vmem>>, vector<16x1xf32>
    %9 = vector.broadcast %8 : vector<16x1xf32> to vector<16x128xf32>
    %10 = arith.mulf %7, %9 : vector<16x128xf32>
    %c0_5 = arith.constant 0 : index
    %c0_6 = arith.constant 0 : index
    %11 = vector.load %arg4[%c0_5, %c0_6] : memref<16x128xf32, #tpu.memory_space<vmem>>, vector<16x128xf32>
    tpu.vector_store %arg4[%c0_5, %c0_6], %10 {strides = array<i32>} : memref<16x128xf32, #tpu.memory_space<vmem>>, vector<16x128xf32>,
    return
  }
  func.func @transform_0(%arg0: i32) -> (i32, i32) {
    %c0_i32 = arith.constant 0 : i32
    %c0_i32_0 = arith.constant 0 : i32
    return %arg0, %c0_i32 : i32, i32
  }
  func.func @transform_1(%arg0: i32) -> (i32, i32) {
    %c0_i32 = arith.constant 0 : i32
    %c0_i32_0 = arith.constant 0 : i32
    return %arg0, %c0_i32 : i32, i32
  }
  func.func @transform_2(%arg0: i32) -> (i32, i32) {
    %c0_i32 = arith.constant 0 : i32
    %c0_i32_0 = arith.constant 0 : i32
    %c0_i32_1 = arith.constant 0 : i32
    return %c0_i32, %c0_i32_0 : i32, i32
  }
  func.func @transform_3(%arg0: i32) -> (i32, i32) {
    %c0_i32 = arith.constant 0 : i32
    %c0_i32_0 = arith.constant 0 : i32
    return %arg0, %c0_i32 : i32, i32
  }
}

</mosaic_0001>

<bundles_post_ra>
// kernel: _embed_onehot.1
= control target key start
LH: loop header
LB: loop body
LE: loop exit
PB: predicated region body
PF: predicated region fallthrough
CT: control target
= control target key end

     0   :  { %8 = vsyncpa [#allocation3], 0  ;;  %s341_s0 = inlined_call_operand.vmem [shape: s32[16,1], index: 0, kind: input, shape index: {}]   ;;  %s342_s1 = inlined_call_operand.vmem [shape: f32[16,1], index: 1, kind: input, shape index: {}]   ;;  %s343_s2 = inlined_call_operand.hbm [shape: f32[64,128], index: 2, kind: input, shape index: {}]   ;;  %s344_s3 = inlined_call_operand.hbm [shape: f32[16,128], index: 3, kind: output, shape index: {}]  }
   0x1   :  { %9 = vsyncpa [#allocation4], 0  ;;  %s273_s12 = smov [#allocation2]   ;;  %s225_s16 = scalar_lea.hbm %s343_s2, 1024 }
   0x2   :  { %s19_s13 = sshll.u32 %s273_s12, 4  ;;  %p226_p0 = scmp.ne.s32.totalorder %s343_s2, %s225_s16  ;;  %s20_s13 = int_to_ptr.vmem [resolvable:$true] %s19_s13 }
   0x3   :  { %p229_p1 = scmp.lt.u32.totalorder %s225_s16, %s343_s2 }
   0x5   :  { %p231_p2 = pnand %p229_p1, %p226_p0 }
   0x7   :  { %234 = shalt.err (!%p231_p2)
}
   0x8   :  { %s235_s21 = scalar_lea.vmem %s20_s13, 1024  ;;  %p240_p4 = scmp.lt.s32.totalorder %s20_s13, %s20_s13 }
   0x9   :  { %p236_p3 = scmp.ne.s32.totalorder %s20_s13, %s235_s21  ;;  %p241_p5 = scmp.lt.s32.totalorder %s235_s21, %s235_s21 }
   0xb   :  { %p242_p6 = por %p241_p5, %p240_p4 }
   0xd   :  { %p243_p7 = pnand %p242_p6, %p236_p3 }
   0xf   :  { %246 = shalt.err (!%p243_p7)
}
  0x10   :  { %s274_s22 = smov 128   ;;  %s275_s23 = smov 8  }
  0x11   :  { %25 = dma.hbm_to_vmem [thread:$0]  %s343_s2, 1024, %s20_s13, [#allocation3], %s274_s22, %s274_s22, %s275_s23  }
  0x12   :  { %269 = dma.done.wait [#allocation3], 1024  }
  0x13   :  { %270 = vsyncadd [#allocation3], 4294966272  ;;  %v276_v0 = vmov 0   ;;  %v29_v1 = vld [vmem:[%s341_s0] sm:$0xff]  ;;  %v46_v3 = vld [vmem:[#allocation2 + $0x8] sm:$0xff]  ;;  %v31_v17 = vlaneseq  ;;  %vm53_vm0 = vcmask 523264  }
  0x14   :  { %223 = vset.pattern.permute.xlu0 %v276_v0  ;;  %224 = vset.pattern.permute.xlu1 %v276_v0  ;;  %v45_v2 = vld [vmem:[#allocation2] sm:$0xff]  ;;  %v47_v4 = vld [vmem:[#allocation2 + $0x10] sm:$0xff]  ;;  %v48_v5 = vld [vmem:[#allocation2 + $0x18] sm:$0xff]  ;;  %v277_v20 = vmov 0.0  }
  0x15   :  { %34 = vperm.xlu0 %223, %v29_v1   ;;  %v30_v6 = vld [vmem:[%s341_s0 + $0x8] sm:$0xff]  ;;  %v201_v7 = vpack.c.bf16 %v46_v3, %v45_v2  ;;  %v205_v8 = vpack.c.bf16 %v48_v5, %v47_v4  ;;  %v49_v9 = vld [vmem:[#allocation2 + $0x20] sm:$0xff]  ;;  %v51_v12 = vld [vmem:[#allocation2 + $0x30] sm:$0xff]  ;;  %v32_v18 = vand.u32 127, %v31_v17  ;;  %s278_s0 = smov [#allocation5]  }
  0x16   :  { %v50_v10 = vld [vmem:[#allocation2 + $0x28] sm:$0xff]  ;;  %v52_v13 = vld [vmem:[#allocation2 + $0x38] sm:$0xff]  ;;  %v135_v14 = vld [vmem:[%s342_s1] sm:$0xff] }
  0x17   :  { %202 = vmatprep.subr.bf16.mxu0 %v201_v7  ;;  %v209_v11 = vpack.c.bf16 %v50_v10, %v49_v9  ;;  %139 = vperm.xlu1 %224, %v135_v14   ;;  %v136_v15 = vld [vmem:[%s342_s1 + $0x8] sm:$0xff]  ;;  %v213_v16 = vpack.c.bf16 %v52_v13, %v51_v12  ;;  %s156_s1 = sshll.u32 %s278_s0, 4  ;;  %s157_s1 = int_to_ptr.vmem [resolvable:$true] %s156_s1 }
  0x18   :  { %204 = vmatpush3.bf16.msra.mxu0 %v201_v7  ;;  %s247_s6 = scalar_lea.vmem %s157_s1, 256  ;;  %p252_p9 = scmp.lt.s32.totalorder %s157_s1, %s157_s1 }
  0x19   :  { %37 = vperm.xlu0 %223, %v30_v6   ;;  %206 = vmatprep.subr.bf16.mxu0 %v205_v8  ;;  %p248_p8 = scmp.ne.s32.totalorder %s157_s1, %s247_s6  ;;  %p253_p10 = scmp.lt.s32.totalorder %s247_s6, %s247_s6 }
  0x1b   :  { %144 = vperm.xlu1 %224, %v136_v15   ;;  %p254_p11 = por %p253_p10, %p252_p9 }
  0x1c   :  { %208 = vmatpush3.bf16.msra.mxu0 %v205_v8 }
  0x1d   :  { %210 = vmatprep.subr.bf16.mxu0 %v209_v11  ;;  %p255_p12 = pnand %p254_p11, %p248_p8 }
  0x20   :  { %212 = vmatpush3.bf16.msra.mxu0 %v209_v11 }
  0x21   :  { %214 = vmatprep.subr.bf16.mxu0 %v213_v16 }
  0x24   :  { %216 = vmatpush3.bf16.msra.mxu0 %v213_v16 }
  0x94   :  { %v35_v19 = vpop.permute.xlu0 %34 }
  0x95   :  { %vm39_vm1 = vcmp.eq.s32.totalorder %v35_v19, %v32_v18 }
  0x96   :  { %v168_v21 = vsel %vm39_vm1, 1.0, %v277_v20  ;;  %v140_v24 = vpop.permute.xlu1 %139 }
  0x97   :  { %198 = vmatprep.mubr.msk.f32.mxu0 %vm53_vm0, %v168_v21 }
  0x98   :  { %v38_v22 = vpop.permute.xlu0 %37 }
  0x99   :  { %vm40_vm2 = vcmp.eq.s32.totalorder %v38_v22, %v32_v18 }
  0x9a   :  { %v169_v23 = vsel %vm40_vm2, 1.0, %v277_v20  ;;  %v145_v25 = vpop.permute.xlu1 %144 }
  0x9b   :  { %199 = vmatmul.mubr.msk.f32.vlgmr.msra.gmra.mrb[0].mxu0 %vm53_vm0, %v169_v23 }
 0x16e   :  { %v200_v26 = vpop.f32.mrb[0].mxu0 }
 0x16f   :  { %v148_v27 = vmul.f32 %v200_v26, %v145_v25  ;;  %v126_v28 = vpop.f32.mrb[1].mxu0 }
 0x170   :  { %v147_v29 = vmul.f32 %v140_v24, %v126_v28 }
 0x171   :  { %150 = vst [vmem:[#allocation5 + $0x8] sm:$0xff] %v148_v27 }
 0x172   :  { %149 = vst [vmem:[#allocation5] sm:$0xff] %v147_v29 }
 0x173   :  { %258 = shalt.err (!%p255_p12)
}
 0x174   :  { %s259_s9 = scalar_lea.hbm %s344_s3, 256 }
 0x175   :  { %p260_p13 = scmp.ne.s32.totalorder %s344_s3, %s259_s9  ;;  %p263_p0 = scmp.lt.u32.totalorder %s259_s9, %s344_s3 }
 0x177   :  { %p265_p1 = pnand %p263_p0, %p260_p13 }
 0x179   :  { %268 = shalt.err (!%p265_p1)
}
 0x17a   :  { %162 = dma.vmem_to_hbm [thread:$0]  %s157_s1, 256, %s344_s3, [#allocation4], %s274_s22, %s274_s22, %s275_s23  }
 0x17b   :  { %271 = dma.done.wait [#allocation4], 256  }
 0x17c   :  { %272 = vsyncadd [#allocation4], 4294967040 }
 0x17d   :  { %166 = vsyncpa [#allocation3], 1 }
 0x17e   :  { %167 = vsyncpa [#allocation4], 1 }

</bundles_post_ra>
